<compile_context>
chip_gen: v7x
topology: tpu7x:2x2x1
jax: 0.10.0
libtpu: 0.0.40
codegen_flags: <defaults>
</compile_context>

<pallas_src>
import functools

import jax
import jax.numpy as jnp
from jax.experimental import pallas as pl
from jax.experimental.pallas import tpu as pltpu

LN_EPS = 1e-5  # PyTorch LayerNorm default


def _mlp_epilogue(z, b, gamma, beta):
    """bias add + LayerNorm(last axis) + ReLU, all in f32 (VPU/EUP work)."""
    z = z + b
    mean = jnp.mean(z, axis=-1, keepdims=True)
    c = z - mean
    var = jnp.mean(c * c, axis=-1, keepdims=True)
    z = c * jax.lax.rsqrt(var + LN_EPS)          # rsqrt -> EUP slot (free-ish)
    z = z * gamma + beta
    return jnp.maximum(z, 0.0)


def _pick_batch_tile(batch, n_vec):
    """Batch elements per grid step.

    Target >=128 rows folded into the matmul M dim (Bt * n_vec >= 128), but keep
    >=2 grid steps when the batch allows it so v7x's second TensorCore is used.
    """
    target_bt = max(1, 128 // max(n_vec, 1))
    divisors = [d for d in range(1, batch + 1) if batch % d == 0]
    cands = [d for d in divisors if d <= target_bt] or [1]
    bt = max(cands)
    if batch // bt < 2:
        two_step = [d for d in cands if batch // d >= 2]
        if two_step:
            bt = max(two_step)
    return bt


# --------------------------------------------------------------------------
# Fused kernel: all SubGraphLayers + final max-pool in one pallas_call.
# --------------------------------------------------------------------------
def _fused_subgraph_kernel(x_ref, *refs):
    o_ref = refs[-1]
    p_refs = refs[:-1]                       # (w, b, gamma, beta) per layer
    n_layers = len(p_refs) // 4

    bt, n_vec, _ = x_ref.shape
    h = x_ref[...]                           # (Bt, n, L0), f32
    m = None                                 # pooled feature of current layer

    for i in range(n_layers):                # unrolled at trace time
        w_ref, b_ref, g_ref, be_ref = p_refs[4 * i: 4 * i + 4]
        w = w_ref[...]                       # (L_in, L_in), resident in VMEM
        l_out = w.shape[1]
        l_prev = h.shape[-1]
        h2d = h.reshape(bt * n_vec, l_prev)  # fold (Bt, n) into matmul M dim

        if i == 0:
            z = jnp.dot(h2d, w, preferred_element_type=jnp.float32)
            z = z.reshape(bt, n_vec, l_out)
        else:
            # Layer input is concat([broadcast(m), h], -1).  Never materialize
            # it: concat([m_b, h]) @ W == broadcast(m @ W[:Lp]) + h @ W[Lp:].
            z_vec = jnp.dot(h2d, w[l_prev:, :], preferred_element_type=jnp.float32)
            z_pool = jnp.dot(m, w[:l_prev, :], preferred_element_type=jnp.float32)
            z = z_vec.reshape(bt, n_vec, l_out) + z_pool.reshape(bt, 1, l_out)

        h = _mlp_epilogue(z, b_ref[...], g_ref[...], be_ref[...])  # (Bt, n, l_out)
        m = jnp.max(h, axis=1)                                     # (Bt, l_out)

    # Whole-subgraph output: max_n(concat([broadcast(m), h])) == concat([m, m]).
    # Stores are at 128-aligned lane offsets for the default sizes (unmasked).
    l_last = m.shape[-1]
    o_ref[:, 0:l_last] = m
    o_ref[:, l_last:2 * l_last] = m


def subgraph_forward(x, params):
    """Fused SubGraph forward.  x: (B, n, L0) -> (B, 2 * L_last)."""
    B, n, L0 = x.shape
    L_last = params[-1][0].shape[1]
    bt = _pick_batch_tile(B, n)

    in_specs = [pl.BlockSpec((bt, n, L0), lambda i: (i, 0, 0))]
    flat_params = []
    for (w, b, gamma, beta) in params:
        L = w.shape[0]
        in_specs += [
            pl.BlockSpec((L, L), lambda i: (0, 0)),
            pl.BlockSpec((1, L), lambda i: (0, 0)),
            pl.BlockSpec((1, L), lambda i: (0, 0)),
            pl.BlockSpec((1, L), lambda i: (0, 0)),
        ]
        flat_params += [w, b, gamma, beta]

    return pl.pallas_call(
        _fused_subgraph_kernel,
        out_shape=jax.ShapeDtypeStruct((B, 2 * L_last), jnp.float32),
        grid_spec=pltpu.PrefetchScalarGridSpec(
            num_scalar_prefetch=0,
            grid=(B // bt,),
            in_specs=in_specs,
            out_specs=pl.BlockSpec((bt, 2 * L_last), lambda i: (i, 0)),
        ),
        compiler_params=pltpu.CompilerParams(
            dimension_semantics=("parallel",)
        ),
    )(x, *flat_params)


# --------------------------------------------------------------------------
# Standalone SubGraphLayer (the module in the spec): (B, n, L) -> (B, n, 2L).
# --------------------------------------------------------------------------
def _subgraph_layer_kernel(x_ref, w_ref, b_ref, g_ref, be_ref, m_ref, h_ref):
    bt, n_vec, L = x_ref.shape
    x2d = x_ref[...].reshape(bt * n_vec, L)          # fold batch tile into M
    z = jnp.dot(x2d, w_ref[...], preferred_element_type=jnp.float32)
    h = _mlp_epilogue(z, b_ref[...], g_ref[...], be_ref[...])
    h = h.reshape(bt, n_vec, L)
    h_ref[...] = h
    m_ref[...] = jnp.max(h, axis=1, keepdims=True)   # (Bt, 1, L)


def subgraph_layer(x, w, b, gamma, beta):
    """Direct SubGraphLayer.forward equivalent."""
    B, n, L = x.shape
    bt = _pick_batch_tile(B, n)
    m, h = pl.pallas_call(
        _subgraph_layer_kernel,
        out_shape=(jax.ShapeDtypeStruct((B, 1, L), jnp.float32),
                   jax.ShapeDtypeStruct((B, n, L), jnp.float32)),
        grid_spec=pltpu.PrefetchScalarGridSpec(
            num_scalar_prefetch=0,
            grid=(B // bt,),
            in_specs=[
                pl.BlockSpec((bt, n, L), lambda i: (i, 0, 0)),
                pl.BlockSpec((L, L), lambda i: (0, 0)),
                pl.BlockSpec((1, L), lambda i: (0, 0)),
                pl.BlockSpec((1, L), lambda i: (0, 0)),
                pl.BlockSpec((1, L), lambda i: (0, 0)),
            ],
            out_specs=(pl.BlockSpec((bt, 1, L), lambda i: (i, 0, 0)),
                       pl.BlockSpec((bt, n, L), lambda i: (i, 0, 0))),
        ),
        compiler_params=pltpu.CompilerParams(
            dimension_semantics=("parallel",)
        ),
    )(x, w, b, gamma, beta)
    # Kernel outputs are lane-dense (lane dim = L); the trivial broadcast+concat
    # is done in the wrapper instead of via masked sub-128-lane in-kernel stores.
    return jnp.concatenate([jnp.broadcast_to(m, h.shape), h], axis=-1)


# --------------------------------------------------------------------------
# Parameters, pure-JAX reference, test.
# --------------------------------------------------------------------------
def init_subgraph_params(key, v_len, layers_number):
    """Layer i works on vectors of length v_len * 2**i.  W:(L,L), b/gamma/beta:(1,L)."""
    params = []
    for i in range(layers_number):
        L = v_len * (2 ** i)
        key, kw, kb = jax.random.split(key, 3)
        bound = 1.0 / jnp.sqrt(L)                    # torch.nn.Linear default range
        w = jax.random.uniform(kw, (L, L), jnp.float32, -bound, bound)
        b = jax.random.uniform(kb, (1, L), jnp.float32, -bound, bound)
        gamma = jnp.ones((1, L), jnp.float32)
        beta = jnp.zeros((1, L), jnp.float32)
        params.append((w, b, gamma, beta))
    return params


def _reference_layer(x, w, b, gamma, beta):
    h = jnp.einsum("bnl,lk->bnk", x, w) + b[None, :, :]
    mean = jnp.mean(h, axis=-1, keepdims=True)
    var = jnp.mean((h - mean) ** 2, axis=-1, keepdims=True)
    h = (h - mean) / jnp.sqrt(var + LN_EPS)
    h = h * gamma[None, :, :] + beta[None, :, :]
    h = jnp.maximum(h, 0.0)
    m = jnp.broadcast_to(jnp.max(h, axis=1, keepdims=True), h.shape)
    return jnp.concatenate([m, h], axis=-1)


def _reference_forward(x, params):
    for (w, b, gamma, beta) in params:
        x = _reference_layer(x, w, b, gamma, beta)
    return jnp.max(x, axis=1)


if __name__ == "__main__":
    # batch=2, n_vectors=8, v_len=32, 3 subgraph layers -> output length 256.
    B, N, V_LEN, LAYERS = 2, 8, 32, 3

    key = jax.random.PRNGKey(0)
    key, kx = jax.random.split(key)
    x = jax.random.normal(kx, (B, N, V_LEN), jnp.float32)
    params = init_subgraph_params(key, V_LEN, LAYERS)

    # 1) Single SubGraphLayer (the spec module): (B, n, L) -> (B, n, 2L).
    w0, b0, g0, be0 = params[0]
    y_layer = jax.block_until_ready(subgraph_layer(x, w0, b0, g0, be0))
    y_ref = _reference_layer(x, w0, b0, g0, be0)
    assert y_layer.shape == (B, N, 2 * V_LEN), y_layer.shape
    assert jnp.allclose(y_layer, y_ref, atol=5e-4, rtol=5e-4), (
        float(jnp.max(jnp.abs(y_layer - y_ref)))
    )

    # 2) Fully fused SubGraph (all layers + final max-pool in one kernel).
    out = jax.block_until_ready(subgraph_forward(x, params))
    ref = _reference_forward(x, params)
    assert out.shape == (B, V_LEN * 2 ** LAYERS), out.shape
    assert jnp.allclose(out, ref, atol=5e-4, rtol=5e-4), (
        float(jnp.max(jnp.abs(out - ref)))
    )

    print("KERNEL_OK")
</pallas_src>

<mosaic_0001>
module attributes {stable_mosaic.version = 11 : i64} {
  func.func @_subgraph_layer_kernel(%arg0: i32, %arg1: memref<1x8x32xf32, #tpu.memory_space<vmem>>, %arg2: memref<32x32xf32, #tpu.memory_space<vmem>>, %arg3: memref<1x32xf32, #tpu.memory_space<vmem>>, %arg4: memref<1x32xf32, #tpu.memory_space<vmem>>, %arg5: memref<1x32xf32, #tpu.memory_space<vmem>>, %arg6: memref<1x1x32xf32, #tpu.memory_space<vmem>>, %arg7: memref<1x8x32xf32, #tpu.memory_space<vmem>>) attributes {dimension_semantics = [#tpu.dimension_semantics<parallel>], iteration_bounds = array<i64: 2>, scalar_prefetch = 0 : i64, scratch_operands = 0 : i64, tpu.core_type = #tpu.core_type<tc>, window_params = [{transform_indices = @transform_0, window_bounds = array<i64: 1, 8, 32>}, {pipeline_mode = #tpu.pipeline_mode<synchronous>, transform_indices = @transform_1, window_bounds = array<i64: 32, 32>}, {pipeline_mode = #tpu.pipeline_mode<synchronous>, transform_indices = @transform_2, window_bounds = array<i64: 1, 32>}, {pipeline_mode = #tpu.pipeline_mode<synchronous>, transform_indices = @transform_3, window_bounds = array<i64: 1, 32>}, {pipeline_mode = #tpu.pipeline_mode<synchronous>, transform_indices = @transform_4, window_bounds = array<i64: 1, 32>}, {transform_indices = @transform_5, window_bounds = array<i64: 1, 1, 32>}, {transform_indices = @transform_6, window_bounds = array<i64: 1, 8, 32>}]} {
    %c0 = arith.constant 0 : index
    %c0_0 = arith.constant 0 : index
    %c0_1 = arith.constant 0 : index
    %0 = vector.load %arg1[%c0, %c0_0, %c0_1] : memref<1x8x32xf32, #tpu.memory_space<vmem>>, vector<1x8x32xf32>
    %1 = vector.shape_cast %0 : vector<1x8x32xf32> to vector<8x32xf32>
    %c0_2 = arith.constant 0 : index
    %c0_3 = arith.constant 0 : index
    %2 = vector.load %arg2[%c0_2, %c0_3] : memref<32x32xf32, #tpu.memory_space<vmem>>, vector<32x32xf32>
    %cst = arith.constant dense<0.000000e+00> : vector<8x32xf32>
    %3 = tpu.matmul %1, %2, %cst {dimension_numbers = #tpu.dot_dimension_numbers<[1], [0], [0], [1], [0, 0, 1, 1], [], []>} : vector<8x32xf32>, vector<32x32xf32>, vector<8x32xf32> -> vector<8x32xf32>
    %c0_4 = arith.constant 0 : index
    %c0_5 = arith.constant 0 : index
    %4 = vector.load %arg3[%c0_4, %c0_5] : memref<1x32xf32, #tpu.memory_space<vmem>>, vector<1x32xf32>
    %c0_6 = arith.constant 0 : index
    %c0_7 = arith.constant 0 : index
    %5 = vector.load %arg4[%c0_6, %c0_7] : memref<1x32xf32, #tpu.memory_space<vmem>>, vector<1x32xf32>
    %c0_8 = arith.constant 0 : index
    %c0_9 = arith.constant 0 : index
    %6 = vector.load %arg5[%c0_8, %c0_9] : memref<1x32xf32, #tpu.memory_space<vmem>>, vector<1x32xf32>
    %7 = vector.broadcast %4 : vector<1x32xf32> to vector<8x32xf32>
    %8 = arith.addf %3, %7 : vector<8x32xf32>
    %cst_10 = arith.constant dense<0.000000e+00> : vector<8xf32>
    %9 = vector.multi_reduction <add>, %8, %cst_10 [1] : vector<8x32xf32> to vector<8xf32>
    %10 = vector.shape_cast %9 : vector<8xf32> to vector<8x1xf32>
    %cst_11 = arith.constant 3.200000e+01 : f32
    %11 = vector.broadcast %cst_11 : f32 to vector<8x1xf32>
    %12 = arith.divf %10, %11 : vector<8x1xf32>
    %13 = vector.broadcast %12 : vector<8x1xf32> to vector<8x32xf32>
    %14 = arith.subf %8, %13 : vector<8x32xf32>
    %15 = arith.mulf %14, %14 : vector<8x32xf32>
    %cst_12 = arith.constant dense<0.000000e+00> : vector<8xf32>
    %16 = vector.multi_reduction <add>, %15, %cst_12 [1] : vector<8x32xf32> to vector<8xf32>
    %17 = vector.shape_cast %16 : vector<8xf32> to vector<8x1xf32>
    %cst_13 = arith.constant 3.200000e+01 : f32
    %18 = vector.broadcast %cst_13 : f32 to vector<8x1xf32>
    %19 = arith.divf %17, %18 : vector<8x1xf32>
    %cst_14 = arith.constant 9.99999974E-6 : f32
    %20 = vector.broadcast %cst_14 : f32 to vector<8x1xf32>
    %21 = arith.addf %19, %20 : vector<8x1xf32>
    %22 = math.rsqrt %21 : vector<8x1xf32>
    %23 = vector.broadcast %22 : vector<8x1xf32> to vector<8x32xf32>
    %24 = arith.mulf %14, %23 : vector<8x32xf32>
    %25 = vector.broadcast %5 : vector<1x32xf32> to vector<8x32xf32>
    %26 = arith.mulf %24, %25 : vector<8x32xf32>
    %27 = vector.broadcast %6 : vector<1x32xf32> to vector<8x32xf32>
    %28 = arith.addf %26, %27 : vector<8x32xf32>
    %cst_15 = arith.constant 0.000000e+00 : f32
    %29 = vector.broadcast %cst_15 : f32 to vector<8x32xf32>
    %30 = arith.maximumf %28, %29 : vector<8x32xf32>
    %31 = vector.shape_cast %30 : vector<8x32xf32> to vector<1x8x32xf32>
    %c0_16 = arith.constant 0 : index
    %c0_17 = arith.constant 0 : index
    %c0_18 = arith.constant 0 : index
    %32 = vector.load %arg7[%c0_16, %c0_17, %c0_18] : memref<1x8x32xf32, #tpu.memory_space<vmem>>, vector<1x8x32xf32>
    tpu.vector_store %arg7[%c0_16, %c0_17, %c0_18], %31 {strides = array<i32>} : memref<1x8x32xf32, #tpu.memory_space<vmem>>, vector<1x8x32xf32>,
    %cst_19 = arith.constant dense<0xFF800000> : vector<1x32xf32>
    %33 = vector.multi_reduction <maximumf>, %31, %cst_19 [1] : vector<1x8x32xf32> to vector<1x32xf32>
    %34 = vector.shape_cast %33 : vector<1x32xf32> to vector<1x1x32xf32>
    %c0_20 = arith.constant 0 : index
    %c0_21 = arith.constant 0 : index
    %c0_22 = arith.constant 0 : index
    %35 = vector.load %arg6[%c0_20, %c0_21, %c0_22] : memref<1x1x32xf32, #tpu.memory_space<vmem>>, vector<1x1x32xf32>
    tpu.vector_store %arg6[%c0_20, %c0_21, %c0_22], %34 {strides = array<i32>} : memref<1x1x32xf32, #tpu.memory_space<vmem>>, vector<1x1x32xf32>,
    return
  }
  func.func @transform_0(%arg0: i32) -> (i32, i32, i32) {
    %c0_i32 = arith.constant 0 : i32
    %c0_i32_0 = arith.constant 0 : i32
    %c0_i32_1 = arith.constant 0 : i32
    return %arg0, %c0_i32, %c0_i32_0 : i32, i32, i32
  }
  func.func @transform_1(%arg0: i32) -> (i32, i32) {
    %c0_i32 = arith.constant 0 : i32
    %c0_i32_0 = arith.constant 0 : i32
    %c0_i32_1 = arith.constant 0 : i32
    return %c0_i32, %c0_i32_0 : i32, i32
  }
  func.func @transform_2(%arg0: i32) -> (i32, i32) {
    %c0_i32 = arith.constant 0 : i32
    %c0_i32_0 = arith.constant 0 : i32
    %c0_i32_1 = arith.constant 0 : i32
    return %c0_i32, %c0_i32_0 : i32, i32
  }
  func.func @transform_3(%arg0: i32) -> (i32, i32) {
    %c0_i32 = arith.constant 0 : i32
    %c0_i32_0 = arith.constant 0 : i32
    %c0_i32_1 = arith.constant 0 : i32
    return %c0_i32, %c0_i32_0 : i32, i32
  }
  func.func @transform_4(%arg0: i32) -> (i32, i32) {
    %c0_i32 = arith.constant 0 : i32
    %c0_i32_0 = arith.constant 0 : i32
    %c0_i32_1 = arith.constant 0 : i32
    return %c0_i32, %c0_i32_0 : i32, i32
  }
  func.func @transform_5(%arg0: i32) -> (i32, i32, i32) {
    %c0_i32 = arith.constant 0 : i32
    %c0_i32_0 = arith.constant 0 : i32
    %c0_i32_1 = arith.constant 0 : i32
    return %arg0, %c0_i32, %c0_i32_0 : i32, i32, i32
  }
  func.func @transform_6(%arg0: i32) -> (i32, i32, i32) {
    %c0_i32 = arith.constant 0 : i32
    %c0_i32_0 = arith.constant 0 : i32
    %c0_i32_1 = arith.constant 0 : i32
    return %arg0, %c0_i32, %c0_i32_0 : i32, i32, i32
  }
}

</mosaic_0001>

<bundles_post_ra>
// kernel: tpu_custom_call.1
= control target key start
LH: loop header
LB: loop body
LE: loop exit
PB: predicated region body
PF: predicated region fallthrough
CT: control target
= control target key end

     0   :  { %12 = vsyncpa [#allocation3], 0  ;;  %s1119_s0 = inlined_call_operand.hbm [shape: f32[2,8,32], index: 0, kind: input, shape index: {}]   ;;  %s1120_s1 = inlined_call_operand.hbm [shape: f32[32,32], index: 1, kind: input, shape index: {}]   ;;  %s1121_s2 = inlined_call_operand.vmem [shape: f32[1,32], index: 2, kind: input, shape index: {}]   ;;  %s1122_s3 = inlined_call_operand.vmem [shape: f32[1,32], index: 3, kind: input, shape index: {}]   ;;  %s1123_s4 = inlined_call_operand.vmem [shape: f32[1,32], index: 4, kind: input, shape index: {}]   ;;  %s1124_s5 = inlined_call_operand.hbm [shape: f32[2,1,32], index: 5, kind: output, shape index: {0}]   ;;  %s1125_s6 = inlined_call_operand.hbm [shape: f32[2,8,32], index: 6, kind: output, shape index: {1}]  }
   0x1   :  { %14 = vsyncpa [#allocation3 + $0x1], 0 }
   0x2   :  { %15 = vsyncpa [#allocation6], 0 }
   0x3   :  { %16 = vsyncpa [#allocation4], 0 }
   0x4   :  { %18 = vsyncpa [#allocation4 + $0x1], 0 }
   0x5   :  { %19 = vsyncpa [#allocation9], 0 }
   0x6   :  { %21 = vsyncpa [#allocation9 + $0x1], 0  ;;  %s874_s21 = smov 0   ;;  %s876_s22 = smov 0  }
   0x7   :  { %s878_s23 = smov 0   ;;  %s880_s24 = smov 0  }
   0x8 LB: > { %s895_s25 = sadd.s32 4294967295, %s828_s24   ;;  %s558_s26 = sadd.s32 4294967294, %s828_s24   ;;  %s828_s24 = sphi %s880_s24, %s1145_s24   ;;  %s824_s23 = sphi %s878_s23, %s1144_s23   ;;  %s820_s22 = sphi %s876_s22, %s1143_s22   ;;  %s816_s21 = sphi %s874_s21, %s1142_s21  }
   0x9   : > { %p47_p0 = scmp.ne.s32.totalorder %s820_s22, %s816_s21  ;;  %p1126_p1 = scmp.eq.s32.totalorder %s895_s25, 0 }
   0xa   : > { %p161_p3 = scmp.eq.s32.totalorder %s558_s26, 1  ;;  %p559_p5 = scmp.ge.s32.totalorder %s828_s24, 1 }
   0xb   : > { %p904_p4 = por %p1126_p1, %p47_p0  ;;  %p194_p7 = scmp.lt.s32.totalorder %s828_s24, 3 }
   0xc   : > { %p909_p6 = por %p161_p3, %p47_p0  ;;  %s830_s30 = smov [#allocation5]  }
   0xd   : > { %s1129_s27 = scalar_select %p904_p4, 1, 0 }
   0xe   : > { %s1130_s28 = scalar_select %p909_p6, 1, 0 }
   0xf   : > { %p914_p8 = pnand %p559_p5, %p194_p7  ;;  %s206_s7 = sshll.u32 %s830_s30, 4  ;;  %s918_s7 = int_to_ptr.vmem [resolvable:$true] %s206_s7 }
  0x10   : > { %s930_s9 = sadd.s32 1, %s828_s24   ;;  %s34_s10 = sadd.s32 1, %s824_s23 }
  0x11   : > { %s1131_s29 = scalar_select %p914_p8, 1, 0 }
  0x12   : > { %p609_p9 = pneg %p914_p8  ;;  %s31_s11 = ssub.s32 %s828_s24, %s930_s9 }
  0x13   : > { %s668_s14 = scalar_lea.hbm %s1120_s1, 512 }
  0x14   : > { %p925_p11 = pnand %p609_p9, %p1126_p1  ;;  %p669_p12 = scmp.ne.s32.totalorder %s1120_s1, %s668_s14 }
  0x15   : > { %p675_p5 = scmp.lt.u32.totalorder %s668_s14, %s1120_s1 }
  0x16   : > { %p670_p13 = pneg %p925_p11 }
  0x18   : > { %p671_p0 = pnand %p670_p13, %p669_p12 }
  0x1a   : > { %p672_p3 = pneg %p671_p0 }
  0x1c   : > { %p677_p7 = pnand %p675_p5, %p672_p3 }
  0x1e   : > { %680 = shalt.err (!%p677_p7)
}
  0x1f   : > { %s681_s19 = scalar_lea.vmem %s918_s7, 512  ;;  %p689_p2 = scmp.lt.s32.totalorder %s918_s7, %s918_s7 }
  0x20   : > { %p682_p9 = scmp.ne.s32.totalorder %s918_s7, %s681_s19  ;;  %p690_p6 = scmp.lt.s32.totalorder %s681_s19, %s681_s19 }
  0x22   : > { %p684_p10 = pnand %p682_p9, %p670_p13  ;;  %p691_p4 = por %p690_p6, %p689_p2 }
  0x24   : > { %p685_p1 = pneg %p684_p10 }
  0x26   : > { %p692_p8 = pnand %p691_p4, %p685_p1 }
  0x28   : > { %695 = shalt.err (!%p692_p8)
}
  0x29   : > { %s831_s20 = smov 128   ;;  %s832_s26 = smov 8  }
  0x2a   : > { %612 = dma.hbm_to_vmem [thread:$0]  (!%p925_p11), %s1120_s1, 512, %s918_s7, [#allocation6], %s831_s20, %s831_s20, %s832_s26  }
  0x2b   : > { %p32_p2 = scmp.eq.s32.totalorder %s31_s11, 0  ;;  %p41_p1 = scmp.ne.s32.totalorder %s824_s23, %s820_s22 }
  0x2c   : > { %p42_p4 = scmp.eq.s32.totalorder %s828_s24, 0  ;;  %p625_p6 = scmp.lt.s32.totalorder %s828_s24, 2 }
  0x2d   : > { %s961_s13 = scalar_select %p32_p2, %s824_s23, %s34_s10  }
  0x2e   : > { %p43_p8 = por %p42_p4, %p41_p1  ;;  %p1133_p10 = scmp.eq.s32.totalorder %s895_s25, 1 }
  0x2f   : > { %s229_s15 = sand.u32 1, %s824_s23   ;;  %s563_s16 = sshll.u32 %s828_s24, 7 }
  0x30   : > { %p965_p12 = por %p1133_p10, %p41_p1  ;;  %s562_s17 = sshll.u32 %s229_s15, 3 }
  0x31   : > { %s974_s19 = scalar_lea.hbm %s1119_s0, %s563_s16  ;;  %s233_s7 = scalar_lea.vmem [#allocation2], %s562_s17 }
  0x32   : > { %s240_s10 = sshll.u32 %s233_s7, 4  ;;  %p976_p11 = pnand %p625_p6, %p43_p8  ;;  %s980_s10 = int_to_ptr.vmem [resolvable:$true] %s240_s10 }
  0x33   : > { %s230_s20 = scalar_lea.sflag [#allocation3], %s229_s15  ;;  %s696_s26 = scalar_lea.hbm %s974_s19, 128 }
  0x34   : > { %p697_p13 = scmp.ne.s32.totalorder %s974_s19, %s696_s26  ;;  %p698_p0 = pneg %p976_p11 }
  0x35   : > { %s701_s16 = scalar_lea.hbm %s1119_s0, 256  ;;  %p702_p7 = scmp.lt.u32.totalorder %s974_s19, %s1119_s0 }
  0x36   : > { %p699_p3 = pnand %p698_p0, %p697_p13  ;;  %p703_p9 = scmp.lt.u32.totalorder %s701_s16, %s696_s26 }
  0x37   : > { %p705_p1 = scmp.lt.u32.totalorder %s696_s26, %s974_s19 }
  0x38   : > { %p700_p5 = pneg %p699_p3  ;;  %p704_p2 = por %p703_p9, %p702_p7 }
  0x3a   : > { %p706_p4 = por %p705_p1, %p704_p2 }
  0x3c   : > { %p707_p6 = pnand %p706_p4, %p700_p5 }
  0x3e   : > { %710 = shalt.err (!%p707_p6)
}
  0x3f   : > { %s711_s15 = scalar_lea.vmem %s980_s10, 128  ;;  %s833_s18 = smov [#allocation2]  }
  0x40   : > { %p712_p8 = scmp.ne.s32.totalorder %s980_s10, %s711_s15  ;;  %s716_s7 = sshll.u32 %s833_s18, 4  ;;  %s717_s7 = int_to_ptr.vmem [resolvable:$false] %s716_s7 }
  0x41   : > { %s718_s30 = scalar_lea.vmem %s717_s7, 256  ;;  %p719_p3 = scmp.lt.s32.totalorder %s980_s10, %s717_s7 }
  0x42   : > { %p714_p10 = pnand %p712_p8, %p698_p0  ;;  %p720_p7 = scmp.lt.s32.totalorder %s718_s30, %s711_s15 }
  0x44   : > { %p715_p13 = pneg %p714_p10  ;;  %p721_p9 = por %p720_p7, %p719_p3 }
  0x46   : > { %p722_p2 = pnand %p721_p9, %p715_p13 }
  0x48   : > { %725 = shalt.err (!%p722_p2)
}
  0x49   : > { %616 = dma.hbm_to_vmem [thread:$0]  (!%p976_p11), %s974_s19, 128, %s980_s10, %s230_s20  }
  0x4a   : > { %p1136_p5 = scmp.ne.s32.totalorder %s1131_s29, 0 }
  0x4b   : > { %s1010_s26 = sand.u32 (!%p1136_p5), 1, %s820_s22   ;;  %p1137_p0 = scmp.ne.s32.totalorder (!%p1136_p5), %s1129_s27, 0 }
  0x4c   : > { %249 = sbr.rel (%p1136_p5) target bundleno = 666 (0x29a), region = 40  ;;  %s565_s12 = sshll.u32 (!%p1136_p5), %s1010_s26, 3 }
  0x4d   : > { %s252_s16 = scalar_lea.sflag (!%p1136_p5), [#allocation3], %s1010_s26  ;;  %s255_s17 = scalar_lea.vmem (!%p1136_p5), [#allocation2], %s565_s12 }
  0x53   : > { %799 = dma.done.wait (%p1137_p0), %s252_s16, 128  }
  0x54   : > { %801 = vsyncadd (%p1137_p0), %s252_s16, 4294967168  ;;  %p1138_p11 = scmp.eq.s32.totalorder %s895_s25, 0 }
  0x56   : > { %803 = dma.done.wait (%p1138_p11), [#allocation6], 512   ;;  %p1139_p1 = pmov %p1138_p11 }
  0x57   : > { %v834_v0 = vmov 0.0|0.0   ;;  %vm835_vm0 = vmmov 0   ;;  %v836_v1 = vmov 0.0   ;;  %v293_v2 = vld [vmem:[#allocation5] sm:$0xff]  ;;  %v294_v3 = vld [vmem:[#allocation5 + $0x8] sm:$0xff]  ;;  %v295_v4 = vld [vmem:[#allocation5 + $0x10] sm:$0xff] }
  0x58   : > { %805 = vsyncadd (%p1139_p1), [#allocation6], 4294966784  ;;  %593 = vmatprep.subr.bf16.mxu0 %v834_v0  ;;  %590 = vmatprep.mubr.msk.f32.mxu0 %vm835_vm0, %v836_v1  ;;  %v594_v5 = vpack.c.bf16 %v294_v3, %v293_v2  ;;  %v296_v6 = vld [vmem:[#allocation5 + $0x18] sm:$0xff]  ;;  %vm306_vm1 = vcmask 261120   ;;  %v568_v9 = vld [vmem:[%s1121_s2] ss:$0 sm:$0xff] }
  0x59   : > { %v597_v7 = vpack.c.bf16 %v296_v6, %v295_v4  ;;  %v292_v8 = vld [vmem:[%s255_s17] sm:$0xff]  ;;  %s574_s8 = sshll.u32 %s895_s25, 7  ;;  %s291_s15 = scalar_lea.vmem [#allocation8], %s565_s12 }
  0x5a   : > { %595 = vmatpush3.bf16.msra.mxu0 %v594_v5  ;;  %v570_v23 = vld [vmem:[%s1122_s3] ss:$0 sm:$0xff]  ;;  %s450_s18 = sshll.u32 %s291_s15, 4  ;;  %s1042_s16 = scalar_lea.hbm %s1125_s6, %s574_s8  ;;  %s1044_s18 = int_to_ptr.vmem [resolvable:$true] %s450_s18 }
  0x5b   : > { %596 = vmatprep.subr.bf16.mxu0 %v834_v0  ;;  %v571_v25 = vld [vmem:[%s1123_s4] ss:$0 sm:$0xff]  ;;  %s424_s17 = scalar_lea.sflag [#allocation9], %s1010_s26  ;;  %s726_s12 = scalar_lea.vmem %s1044_s18, 128 }
  0x5c   : > { %p727_p4 = scmp.ne.s32.totalorder %s1044_s18, %s726_s12  ;;  %s837_s27 = smov [#allocation8]  }
  0x5d   : > { %s730_s29 = sshll.u32 %s837_s27, 4  ;;  %s731_s29 = int_to_ptr.vmem [resolvable:$false] %s730_s29 }
  0x5e   : > { %598 = vmatpush3.bf16.msra.mxu0 %v597_v7  ;;  %p728_p6 = pnand %p727_p4, %p965_p12  ;;  %s732_s19 = scalar_lea.vmem %s731_s29, 256 }
  0x5f   : > { %p733_p10 = scmp.lt.s32.totalorder %s1044_s18, %s731_s29  ;;  %p734_p13 = scmp.lt.s32.totalorder %s732_s19, %s726_s12 }
  0x60   : > { %p729_p8 = pneg %p728_p6 }
  0x61   : > { %591 = vmatmul.mubr.msk.f32.vlgmr.msra.gmra.mrb[0].mxu0 %vm306_vm1, %v292_v8  ;;  %p735_p3 = por %p734_p13, %p733_p10 }
  0x63   : > { %p736_p7 = pnand %p735_p3, %p729_p8 }
 0x134   : > { %v376_v10 = vpop.f32.mrb[0].mxu0 }
 0x135   : > { %v377_v11 = vadd.f32 %v568_v9, %v376_v10  ;;  %v592_v12 = vpop.f32.mrb[1].mxu0 }
 0x137   : > { %v380_v13 = vsel %vm306_vm1, %v377_v11, 0.0 }
 0x138   : > { %381 = vadd.xlane.f32.xlu0 %v380_v13 }
 0x1c5   : > { %v382_v14 = vpop.xlane.xlu0 %381 }
 0x1c6   : > { %v384_v15 = vmul.f32 0.03125, %v382_v14 }
 0x1c8   : > { %v385_v16 = vsub.f32 %v377_v11, %v384_v15 }
 0x1ca   : > { %v386_v17 = vmul.f32 %v385_v16, %v385_v16 }
 0x1cc   : > { %v387_v18 = vsel %vm306_vm1, %v386_v17, 0.0 }
 0x1cd   : > { %388 = vadd.xlane.f32.xlu0 %v387_v18 }
 0x25a   : > { %v389_v19 = vpop.xlane.xlu0 %388 }
 0x25b   : > { %v390_v20 = vmul.f32 0.03125, %v389_v19 }
 0x25d   : > { %v391_v21 = vadd.f32 1e-05, %v390_v20 }
 0x25f   : > { %666 = vrsqrt.f32 %v391_v21 }
 0x269   : > { %v667_v22 = vpop.eup %666 }
 0x26a   : > { %v393_v24 = vmul.f32 %v667_v22, %v385_v16 }
 0x26c   : > { %v400_v26 = vmul.f32 %v570_v23, %v393_v24 }
 0x26e   : > { %v407_v27 = vadd.f32 %v571_v25, %v400_v26 }
 0x270   : > { %v408_v28 = vmax.f32 %v407_v27, 0.0 }
 0x272   : > { %v410_v29 = vsel %vm306_vm1, %v408_v28, -inf  ;;  %409 = vst.msk [vmem:[%s291_s15] sm:$0xff] %vm306_vm1, %v408_v28 }
 0x273   : > { %v411_v30 = vrot.slane %v410_v29, 4 }
 0x274   : > { %739 = shalt.err (!%p736_p7)
}
 0x275   : > { %s740_s10 = scalar_lea.hbm %s1042_s16, 128  ;;  %s744_s8 = scalar_lea.hbm %s1125_s6, 256 }
 0x276   : > { %p741_p9 = scmp.ne.s32.totalorder %s1042_s16, %s740_s10  ;;  %p745_p0 = scmp.lt.u32.totalorder %s1042_s16, %s1125_s6 }
 0x277   : > { %p746_p11 = scmp.lt.u32.totalorder %s744_s8, %s740_s10  ;;  %p748_p4 = scmp.lt.u32.totalorder %s740_s10, %s1042_s16 }
 0x278   : > { %p742_p2 = pnand %p741_p9, %p965_p12 }
 0x279   : > { %p747_p1 = por %p746_p11, %p745_p0 }
 0x27a   : > { %p743_p5 = pneg %p742_p2 }
 0x27b   : > { %p749_p6 = por %p748_p4, %p747_p1 }
 0x27d   : > { %p750_p8 = pnand %p749_p6, %p743_p5 }
 0x27f   : > { %753 = shalt.err (!%p750_p8)
}
 0x280   : > { %606 = dma.vmem_to_hbm [thread:$0]  (%p965_p12), %s1044_s18, 128, %s1042_s16, %s424_s17   ;;  %v412_v31 = vmax.f32 %v410_v29, %v411_v30  ;;  %vm417_vm2 = vcmask 253952  }
 0x281   : > { %s573_s30 = sshll.u32 %s895_s25, 4  ;;  %s284_s12 = scalar_lea.vmem [#allocation7], %s1010_s26 }
 0x282   : > { %v413_v32 = vrot.slane %v412_v31, 2  ;;  %s437_s27 = sshll.u32 %s284_s12, 4  ;;  %s1075_s10 = scalar_lea.hbm %s1124_s5, %s573_s30  ;;  %s1077_s27 = int_to_ptr.vmem [resolvable:$true] %s437_s27 }
 0x283   : > { %s420_s18 = scalar_lea.sflag [#allocation4], %s1010_s26  ;;  %s754_s16 = scalar_lea.vmem %s1077_s27, 16 }
 0x284   : > { %v414_v33 = vmax.f32 %v412_v31, %v413_v32  ;;  %p755_p10 = scmp.ne.s32.totalorder %s1077_s27, %s754_s16  ;;  %s838_s25 = smov [#allocation7]  }
 0x285   : > { %s758_s17 = sshll.u32 %s838_s25, 4  ;;  %s759_s17 = int_to_ptr.vmem [resolvable:$false] %s758_s17 }
 0x286   : > { %v415_v34 = vrot.slane %v414_v33, 1  ;;  %p756_p13 = pnand %p755_p10, %p965_p12  ;;  %s760_s11 = scalar_lea.vmem %s759_s17, 32 }
 0x287   : > { %p761_p7 = scmp.lt.s32.totalorder %s1077_s27, %s759_s17  ;;  %p762_p9 = scmp.lt.s32.totalorder %s760_s11, %s754_s16 }
 0x288   : > { %v416_v35 = vmax.f32 %v414_v33, %v415_v34  ;;  %p757_p3 = pneg %p756_p13 }
 0x289   : > { %p763_p2 = por %p762_p9, %p761_p7 }
 0x28a   : > { %418 = vst.msk [vmem:[%s284_s12] sm:$0x1] %vm417_vm2, %v416_v35 }
 0x28b   : > { %p764_p5 = pnand %p763_p2, %p757_p3 }
 0x28d   : > { %767 = shalt.err (!%p764_p5)
}
 0x28e   : > { %s768_s26 = scalar_lea.hbm %s1075_s10, 16  ;;  %s772_s15 = scalar_lea.hbm %s1124_s5, 32 }
 0x28f   : > { %p769_p0 = scmp.ne.s32.totalorder %s1075_s10, %s768_s26  ;;  %p773_p4 = scmp.lt.u32.totalorder %s1075_s10, %s1124_s5 }
 0x290   : > { %p774_p6 = scmp.lt.u32.totalorder %s772_s15, %s768_s26  ;;  %p776_p10 = scmp.lt.u32.totalorder %s768_s26, %s1075_s10 }
 0x291   : > { %p770_p11 = pnand %p769_p0, %p965_p12 }
 0x292   : > { %p775_p8 = por %p774_p6, %p773_p4 }
 0x293   : > { %p771_p1 = pneg %p770_p11 }
 0x294   : > { %p777_p13 = por %p776_p10, %p775_p8 }
 0x296   : > { %p778_p3 = pnand %p777_p13, %p771_p1 }
 0x298   : > { %781 = shalt.err (!%p778_p3)
}
 0x299   : > { %605 = dma.vmem_to_hbm [thread:$0]  (%p965_p12), %s1077_s27, 16, %s1075_s10, %s420_s18  }
 0x29a PF: > { %s462_s12 = sand.u32 1, %s816_s21   ;;  %p1140_p7 = scmp.ne.s32.totalorder %s1130_s28, 0 }
 0x29b   : > { %p1141_p9 = scmp.ge.s32.totalorder %s828_s24, 2  ;;  %s463_s29 = scalar_lea.sflag [#allocation4], %s462_s12 }
 0x29d   : > { %p618_p2 = pnand %p1141_p9, %p1140_p7 }
 0x29f   : > { %807 = dma.done.wait (!%p618_p2), %s463_s29, 16  }
 0x2a0   : > { %809 = vsyncadd (!%p618_p2), %s463_s29, 4294967280  ;;  %s471_s19 = scalar_lea.sflag [#allocation9], %s462_s12 }
 0x2a1   : > { %811 = dma.done.wait (!%p618_p2), %s471_s19, 128  }
 0x2a2   : > { %813 = vsyncadd (!%p618_p2), %s471_s19, 4294967168  ;;  %p24_p12 = scmp.ge.s32.totalorder %s930_s9, 4   ;;  %s1142_s21 = smov %s820_s22 }
 0x2a3   : > { %s1143_s22 = smov %s824_s23  ;;  %s1144_s23 = smov %s961_s13 }
 0x2a4   : > { %s1145_s24 = smov %s930_s9  ;;  %26 = sbr.rel (!%p24_p12) target bundleno = 8 (0x8), region = 106 }
 0x2ab   :  { %476 = vsyncpa [#allocation3], 1 }
 0x2ac   :  { %478 = vsyncpa [#allocation3 + $0x1], 1 }
 0x2ad   :  { %479 = vsyncpa [#allocation6], 1 }
 0x2ae   :  { %480 = vsyncpa [#allocation4], 1 }
 0x2af   :  { %482 = vsyncpa [#allocation4 + $0x1], 1 }
 0x2b0   :  { %483 = vsyncpa [#allocation9], 1 }
 0x2b1   :  { %485 = vsyncpa [#allocation9 + $0x1], 1 }

</bundles_post_ra>
